<compile_context>
chip_gen: v7x
topology: tpu7x:2x2x1
jax: 0.10.0
libtpu: 0.0.40
codegen_flags: <defaults>
</compile_context>

<pallas_src>
import jax
import jax.numpy as jnp
from jax import lax
from jax.experimental import pallas as pl
from jax.experimental.pallas import tpu as pltpu


def _linear_kernel(x_ref, w_ref, o_ref):
    # x_ref: (TM, H)   w_ref: (TN, H)  -- PyTorch [out, in] layout, no transpose copy
    # o_ref: (TM, TN)
    # y = x @ W^T  ==  contract the shared H axis of x and W.
    o_ref[...] = lax.dot_general(
        x_ref[...],
        w_ref[...],
        dimension_numbers=(((1,), (1,)), ((), ())),
        preferred_element_type=jnp.float32,
    ).astype(o_ref.dtype)


def linear_mlp(x: jax.Array, weight: jax.Array, *, tm: int = 512, tn: int = 256) -> jax.Array:
    """y = x @ weight.T  (weight is [out_features, in_features], no bias).

    Works for any leading dims on x; the matmul acts on the last dim.
    """
    orig_shape = x.shape
    hidden = orig_shape[-1]
    out_features, in_features = weight.shape
    assert in_features == hidden, "weight in_features must match x last dim"

    m = 1
    for d in orig_shape[:-1]:
        m *= d
    x2d = x.reshape(m, hidden)

    # ---- M (row) tiling. If everything fits in one tile, take the full dim
    # (block == full array dim satisfies the (8,128) rule). Otherwise pad m up
    # to a multiple of tm so the trailing block is full (no OOB reads/writes).
    if m <= tm:
        tm_eff = m
        m_pad = m
    else:
        tm_eff = tm
        m_pad = pl.cdiv(m, tm) * tm
        if m_pad != m:
            x2d = jnp.pad(x2d, ((0, m_pad - m), (0, 0)))

    # ---- N (output-feature) tiling. Only tile when cleanly divisible by the
    # MXU-friendly 256; otherwise keep the whole output dim as one lane-dense
    # block. The K (hidden) axis stays whole, so no accumulator is needed.
    if out_features > tn and out_features % tn == 0:
        tn_eff = tn
    else:
        tn_eff = out_features

    grid = (m_pad // tm_eff, out_features // tn_eff)

    itemsize = jnp.dtype(x.dtype).itemsize
    cost = pl.CostEstimate(
        flops=2 * m_pad * hidden * out_features,
        transcendentals=0,
        bytes_accessed=(m_pad * hidden + out_features * hidden + m_pad * out_features)
        * itemsize,
    )

    out2d = pl.pallas_call(
        _linear_kernel,
        out_shape=jax.ShapeDtypeStruct((m_pad, out_features), x.dtype),
        grid_spec=pltpu.PrefetchScalarGridSpec(
            num_scalar_prefetch=0,
            grid=grid,
            in_specs=[
                # x row tile: varies with i, constant over j.
                pl.BlockSpec((tm_eff, hidden), lambda i, j: (i, 0)),
                # weight tile [out, in]: varies only with j, so when the weight
                # fits in one block it stays VMEM-resident across all row tiles.
                pl.BlockSpec((tn_eff, hidden), lambda i, j: (j, 0)),
            ],
            out_specs=pl.BlockSpec((tm_eff, tn_eff), lambda i, j: (i, j)),
        ),
        compiler_params=pltpu.CompilerParams(
            # Both axes are independent (no reduction axis) -> shardable across
            # TensorCores on v7x; harmless on single-TC v5e/v6e.
            dimension_semantics=("parallel", "parallel"),
        ),
        cost_estimate=cost,
    )(x2d, weight)

    if m_pad != m:
        out2d = out2d[:m]
    return out2d.reshape(*orig_shape[:-1], out_features)


if __name__ == "__main__":
    batch, seq, hidden = 2, 8, 32
    key = jax.random.PRNGKey(0)
    kx, kw = jax.random.split(key)

    # --- f32 check (tight tolerance) -------------------------------------
    x = jax.random.normal(kx, (batch, seq, hidden), dtype=jnp.float32)
    bound = 1.0 / (hidden ** 0.5)
    weight = jax.random.uniform(
        kw, (hidden, hidden), dtype=jnp.float32, minval=-bound, maxval=bound
    )

    y = linear_mlp(x, weight)
    jax.block_until_ready(y)

    y_ref = jnp.einsum("bsh,oh->bso", x, weight)
    assert y.shape == (batch, seq, hidden)
    assert jnp.allclose(y, y_ref, atol=1e-5, rtol=1e-5)

    # --- bf16 check (MXU-native dtype; f32 accumulation, looser tolerance) ---
    x_bf = x.astype(jnp.bfloat16)
    w_bf = weight.astype(jnp.bfloat16)
    y_bf = linear_mlp(x_bf, w_bf)
    jax.block_until_ready(y_bf)
    y_bf_ref = jnp.einsum(
        "bsh,oh->bso", x_bf, w_bf, preferred_element_type=jnp.float32
    ).astype(jnp.bfloat16)
    assert jnp.allclose(
        y_bf.astype(jnp.float32), y_bf_ref.astype(jnp.float32), atol=2e-2, rtol=2e-2
    )

    print("KERNEL_OK")
</pallas_src>

<mosaic_0001>
module attributes {stable_mosaic.version = 11 : i64} {
  func.func @_linear_kernel(%arg0: i32, %arg1: i32, %arg2: memref<16x32xf32, #tpu.memory_space<vmem>>, %arg3: memref<32x32xf32, #tpu.memory_space<vmem>>, %arg4: memref<16x32xf32, #tpu.memory_space<vmem>>) attributes {dimension_semantics = [#tpu.dimension_semantics<parallel>, #tpu.dimension_semantics<parallel>], iteration_bounds = array<i64: 1, 1>, scalar_prefetch = 0 : i64, scratch_operands = 0 : i64, tpu.core_type = #tpu.core_type<tc>, window_params = [{transform_indices = @transform_0, window_bounds = array<i64: 16, 32>}, {transform_indices = @transform_1, window_bounds = array<i64: 32, 32>}, {transform_indices = @transform_2, window_bounds = array<i64: 16, 32>}]} {
    %c0 = arith.constant 0 : index
    %c0_0 = arith.constant 0 : index
    %0 = vector.load %arg2[%c0, %c0_0] : memref<16x32xf32, #tpu.memory_space<vmem>>, vector<16x32xf32>
    %c0_1 = arith.constant 0 : index
    %c0_2 = arith.constant 0 : index
    %1 = vector.load %arg3[%c0_1, %c0_2] : memref<32x32xf32, #tpu.memory_space<vmem>>, vector<32x32xf32>
    %cst = arith.constant dense<0.000000e+00> : vector<16x32xf32>
    %2 = tpu.matmul %0, %1, %cst {dimension_numbers = #tpu.dot_dimension_numbers<[1], [1], [0], [0], [0, 0, 1, 0], [], []>} : vector<16x32xf32>, vector<32x32xf32>, vector<16x32xf32> -> vector<16x32xf32>
    %c0_3 = arith.constant 0 : index
    %c0_4 = arith.constant 0 : index
    %3 = vector.load %arg4[%c0_3, %c0_4] : memref<16x32xf32, #tpu.memory_space<vmem>>, vector<16x32xf32>
    tpu.vector_store %arg4[%c0_3, %c0_4], %2 {strides = array<i32>} : memref<16x32xf32, #tpu.memory_space<vmem>>, vector<16x32xf32>,
    return
  }
  func.func @transform_0(%arg0: i32, %arg1: i32) -> (i32, i32) {
    %c0_i32 = arith.constant 0 : i32
    %c0_i32_0 = arith.constant 0 : i32
    return %arg0, %c0_i32 : i32, i32
  }
  func.func @transform_1(%arg0: i32, %arg1: i32) -> (i32, i32) {
    %c0_i32 = arith.constant 0 : i32
    %c0_i32_0 = arith.constant 0 : i32
    return %arg1, %c0_i32 : i32, i32
  }
  func.func @transform_2(%arg0: i32, %arg1: i32) -> (i32, i32) {
    %c0_i32 = arith.constant 0 : i32
    return %arg0, %arg1 : i32, i32
  }
}

</mosaic_0001>

<bundles_post_ra>
// kernel: tpu_custom_call.1
= control target key start
LH: loop header
LB: loop body
LE: loop exit
PB: predicated region body
PF: predicated region fallthrough
CT: control target
= control target key end

     0   :  { %7 = vsyncpa [#allocation3], 0  ;;  %s343_s0 = inlined_call_operand.hbm [shape: f32[16,32], index: 0, kind: input, shape index: {}]   ;;  %s344_s1 = inlined_call_operand.hbm [shape: f32[32,32], index: 1, kind: input, shape index: {}]   ;;  %s345_s2 = inlined_call_operand.hbm [shape: f32[16,32], index: 2, kind: output, shape index: {}]  }
   0x1   :  { %8 = vsyncpa [#allocation6], 0 }
   0x2   :  { %9 = vsyncpa [#allocation4], 0  ;;  %s272_s9 = smov [#allocation2]   ;;  %s200_s13 = scalar_lea.hbm %s343_s0, 256 }
   0x3   :  { %s15_s10 = sshll.u32 %s272_s9, 4  ;;  %p201_p0 = scmp.ne.s32.totalorder %s343_s0, %s200_s13  ;;  %s16_s10 = int_to_ptr.vmem [resolvable:$true] %s15_s10 }
   0x4   :  { %p204_p1 = scmp.lt.u32.totalorder %s200_s13, %s343_s0 }
   0x6   :  { %p206_p2 = pnand %p204_p1, %p201_p0 }
   0x8   :  { %209 = shalt.err (!%p206_p2)
}
   0x9   :  { %s210_s18 = scalar_lea.vmem %s16_s10, 256  ;;  %p215_p4 = scmp.lt.s32.totalorder %s16_s10, %s16_s10 }
   0xa   :  { %p211_p3 = scmp.ne.s32.totalorder %s16_s10, %s210_s18  ;;  %p216_p5 = scmp.lt.s32.totalorder %s210_s18, %s210_s18 }
   0xc   :  { %p217_p6 = por %p216_p5, %p215_p4 }
   0xe   :  { %p218_p7 = pnand %p217_p6, %p211_p3 }
  0x10   :  { %221 = shalt.err (!%p218_p7)
}
  0x11   :  { %s273_s19 = smov 128   ;;  %s274_s20 = smov 8  }
  0x12   :  { %21 = dma.hbm_to_vmem [thread:$0]  %s343_s0, 256, %s16_s10, [#allocation3], %s273_s19, %s273_s19, %s274_s20  }
  0x13   :  { %s275_s23 = smov [#allocation5]   ;;  %s222_s27 = scalar_lea.hbm %s344_s1, 512 }
  0x14   :  { %s27_s24 = sshll.u32 %s275_s23, 4  ;;  %p223_p8 = scmp.ne.s32.totalorder %s344_s1, %s222_s27  ;;  %s28_s24 = int_to_ptr.vmem [resolvable:$true] %s27_s24 }
  0x15   :  { %p226_p9 = scmp.lt.u32.totalorder %s222_s27, %s344_s1 }
  0x17   :  { %p228_p10 = pnand %p226_p9, %p223_p8 }
  0x19   :  { %231 = shalt.err (!%p228_p10)
}
  0x1a   :  { %s232_s4 = scalar_lea.vmem %s28_s24, 512  ;;  %p237_p12 = scmp.lt.s32.totalorder %s28_s24, %s28_s24 }
  0x1b   :  { %p233_p11 = scmp.ne.s32.totalorder %s28_s24, %s232_s4  ;;  %p238_p13 = scmp.lt.s32.totalorder %s232_s4, %s232_s4 }
  0x1d   :  { %p239_p0 = por %p238_p13, %p237_p12 }
  0x1f   :  { %p240_p1 = pnand %p239_p0, %p233_p11 }
  0x21   :  { %243 = shalt.err (!%p240_p1)
}
  0x22   :  { %33 = dma.hbm_to_vmem [thread:$0]  %s344_s1, 512, %s28_s24, [#allocation6], %s273_s19, %s273_s19, %s274_s20  }
  0x23   :  { %266 = dma.done.wait [#allocation3], 256  }
  0x24   :  { %267 = vsyncadd [#allocation3], 4294967040 }
  0x25   :  { %268 = dma.done.wait [#allocation6], 512  }
  0x26   :  { %269 = vsyncadd [#allocation6], 4294966784  ;;  %vm46_vm0 = vcmask 261120   ;;  %v42_v0 = vld [vmem:[#allocation5] sm:$0xff]  ;;  %v43_v1 = vld [vmem:[#allocation5 + $0x8] sm:$0xff]  ;;  %s276_s1 = smov [#allocation7]  }
  0x27   :  { %vm184_vm1 = vmpackc.low %vm46_vm0, %vm46_vm0  ;;  %v44_v2 = vld [vmem:[#allocation5 + $0x10] sm:$0xff]  ;;  %v183_v3 = vpack.c.bf16 %v43_v1, %v42_v0  ;;  %v45_v4 = vld [vmem:[#allocation5 + $0x18] sm:$0xff]  ;;  %s147_s6 = sshll.u32 %s276_s1, 4  ;;  %s148_s6 = int_to_ptr.vmem [resolvable:$true] %s147_s6 }
  0x28   :  { %v40_v5 = vld [vmem:[#allocation2] sm:$0xff]  ;;  %v189_v6 = vpack.c.bf16 %v45_v4, %v44_v2  ;;  %v41_v7 = vld [vmem:[#allocation2 + $0x8] sm:$0xff]  ;;  %s244_s7 = scalar_lea.vmem %s148_s6, 256  ;;  %p249_p3 = scmp.lt.s32.totalorder %s148_s6, %s148_s6 }
  0x29   :  { %180 = vmatprep.mubr.msk.f32.mxu0 %vm46_vm0, %v40_v5  ;;  %185 = vmatprep.subr.msk.bf16.mxu0 %vm184_vm1, %v183_v3  ;;  %p245_p2 = scmp.ne.s32.totalorder %s148_s6, %s244_s7  ;;  %p250_p4 = scmp.lt.s32.totalorder %s244_s7, %s244_s7 }
  0x2a   :  { %188 = vmatpush3.bf16.xpose.msk.msra.mxu0 %vm184_vm1, %v183_v3 }
  0x2b   :  { %191 = vmatprep.subr.msk.bf16.mxu0 %vm184_vm1, %v189_v6  ;;  %p251_p5 = por %p250_p4, %p249_p3 }
  0x2d   :  { %p252_p6 = pnand %p251_p5, %p245_p2 }
  0x32   :  { %194 = vmatpush3.bf16.xpose.msk.msra.mxu0 %vm184_vm1, %v189_v6 }
  0x39   :  { %181 = vmatmul.mubr.msk.f32.vlgmr.msra.gmra.mrb[0].mxu0 %vm46_vm0, %v41_v7 }
 0x10c   :  { %v182_v8 = vpop.f32.mrb[0].mxu0 }
 0x10d   :  { %141 = vst.msk [vmem:[#allocation7 + $0x8] sm:$0xff] %vm46_vm0, %v182_v8  ;;  %v131_v9 = vpop.f32.mrb[1].mxu0 }
 0x10e   :  { %140 = vst.msk [vmem:[#allocation7] sm:$0xff] %vm46_vm0, %v131_v9 }
 0x10f   :  { %255 = shalt.err (!%p252_p6)
}
 0x110   :  { %s256_s10 = scalar_lea.hbm %s345_s2, 256 }
 0x111   :  { %p257_p7 = scmp.ne.s32.totalorder %s345_s2, %s256_s10  ;;  %p260_p8 = scmp.lt.u32.totalorder %s256_s10, %s345_s2 }
 0x113   :  { %p262_p9 = pnand %p260_p8, %p257_p7 }
 0x115   :  { %265 = shalt.err (!%p262_p9)
}
 0x116   :  { %153 = dma.vmem_to_hbm [thread:$0]  %s148_s6, 256, %s345_s2, [#allocation4], %s273_s19, %s273_s19, %s274_s20  }
 0x117   :  { %270 = dma.done.wait [#allocation4], 256  }
 0x118   :  { %271 = vsyncadd [#allocation4], 4294967040 }
 0x119   :  { %157 = vsyncpa [#allocation3], 1 }
 0x11a   :  { %158 = vsyncpa [#allocation6], 1 }
 0x11b   :  { %159 = vsyncpa [#allocation4], 1 }

</bundles_post_ra>
